<compile_context>
chip_gen: v5e
topology: v5e:2x2
jax: 0.10.0
libtpu: 0.0.40
codegen_flags: <defaults>
</compile_context>

<pallas_src>
import jax
import jax.numpy as jnp
from jax.experimental import pallas as pl
from jax.experimental.pallas import tpu as pltpu


def mlp_kernel(x_ref, w1_ref, b1_ref, w2_ref, b2_ref, o_ref):
    """linear1 -> ReLU -> linear2 on one VMEM-resident batch tile."""
    x = x_ref[...]                                                    # (tb, in) bf16
    h = jnp.dot(x, w1_ref[...], preferred_element_type=jnp.float32)   # MXU, f32 acc
    h = jnp.maximum(h + b1_ref[...], 0.0)                             # bias + ReLU in f32 (VPU)
    h = h.astype(w2_ref.dtype)                                        # back to bf16 for the MXU
    y = jnp.dot(h, w2_ref[...], preferred_element_type=jnp.float32) + b2_ref[...]
    o_ref[...] = y.astype(o_ref.dtype)                                # lane-dense (tb, 128k) store


def _round_up(a, b):
    return (a + b - 1) // b * b


def mlp_forward(x, w1, b1, w2, b2, *, batch_tile=512,
                compute_dtype=jnp.bfloat16, out_dtype=None):
    """y = relu(x @ w1 + b1) @ w2 + b2 (semantics of the PyTorch Model.forward)."""
    B, in_dim = x.shape
    hid = w1.shape[1]
    out_dim = w2.shape[1]
    out_dtype = x.dtype if out_dtype is None else out_dtype

    # ---- batch tiling: multi-step grid so x/out tiles double-buffer against
    #      compute and (v7x) the parallel batch axis shards across both TCs.
    tb = min(batch_tile, B)
    if tb < B:
        tb = max(8, (tb // 8) * 8)          # keep sublane-aligned tiles
    B_pad = _round_up(B, tb)

    # ---- lane-dense output: pad out features to a multiple of 128.
    out_pad = _round_up(max(out_dim, 128), 128)

    # ---- operand prep: bf16 activations/weights, f32 biases, zero-pad extras.
    x_p = x if B_pad == B else jnp.pad(x, ((0, B_pad - B), (0, 0)))
    x_p = x_p.astype(compute_dtype)
    w1_c = w1.astype(compute_dtype)
    w2_c = jnp.pad(w2, ((0, 0), (0, out_pad - out_dim))).astype(compute_dtype)
    b1_2d = b1.astype(jnp.float32).reshape(1, hid)
    b2_2d = jnp.pad(b2.astype(jnp.float32), ((0, out_pad - out_dim),)).reshape(1, out_pad)

    # ---- VMEM budget estimate (double-buffered tiles + worst-case weight bufs)
    cbytes = jnp.dtype(compute_dtype).itemsize
    est = (2 * tb * in_dim * cbytes                       # x tiles
           + 2 * tb * out_pad * 4                         # out tiles (f32)
           + 2 * (in_dim * hid + hid * out_pad) * cbytes  # weights (worst case 2 bufs)
           + 2 * (hid + out_pad) * 4                      # biases
           + tb * hid * 4)                                # f32 intermediate
    vmem_limit = int(min(max(2 * est, 16 * 2**20), 64 * 2**20))

    grid = (B_pad // tb,)

    # TODO(synk): if hidden/output grow so w1+w2 no longer fit VMEM resident, add a
    # grid axis over that dim with an f32 scratch accumulator (pl.when init/finalize).

    def _call(single_buffer_weights):
        # Resident (constant-index) blocks don't need double buffering; request
        # a single buffer so weight VMEM cost is 1x (important for v7x 64 MiB).
        resident = ({"pipeline_mode": pl.Buffered(1)}
                    if single_buffer_weights else {})
        fn = pl.pallas_call(
            mlp_kernel,
            out_shape=jax.ShapeDtypeStruct((B_pad, out_pad), out_dtype),
            grid_spec=pltpu.PrefetchScalarGridSpec(
                num_scalar_prefetch=0,
                grid=grid,
                in_specs=[
                    pl.BlockSpec((tb, in_dim), lambda i: (i, 0)),                 # x tile
                    pl.BlockSpec((in_dim, hid), lambda i: (0, 0), **resident),    # w1 resident
                    pl.BlockSpec((1, hid), lambda i: (0, 0), **resident),         # b1 resident
                    pl.BlockSpec((hid, out_pad), lambda i: (0, 0), **resident),   # w2 resident
                    pl.BlockSpec((1, out_pad), lambda i: (0, 0), **resident),     # b2 resident
                ],
                out_specs=pl.BlockSpec((tb, out_pad), lambda i: (i, 0)),
            ),
            compiler_params=pltpu.CompilerParams(
                dimension_semantics=("parallel",),
                vmem_limit_bytes=vmem_limit,
            ),
        )
        out = fn(x_p, w1_c, b1_2d, w2_c, b2_2d)
        return jax.block_until_ready(out)

    try:
        out_p = _call(True)
    except Exception:
        # Fallback for jax versions where pipeline_mode=pl.Buffered(1) isn't
        # supported on the top-level pallas_call pipeline.
        out_p = _call(False)

    return out_p[:B, :out_dim]


def init_params(key, input_size, hidden_size, output_size, dtype=jnp.float32):
    # Mimic nn.Linear default init: U(-1/sqrt(fan_in), 1/sqrt(fan_in)).
    k1, k2, k3, k4 = jax.random.split(key, 4)
    lim1 = 1.0 / (input_size ** 0.5)
    lim2 = 1.0 / (hidden_size ** 0.5)
    w1 = jax.random.uniform(k1, (input_size, hidden_size), dtype, -lim1, lim1)
    b1 = jax.random.uniform(k2, (hidden_size,), dtype, -lim1, lim1)
    w2 = jax.random.uniform(k3, (hidden_size, output_size), dtype, -lim2, lim2)
    b2 = jax.random.uniform(k4, (output_size,), dtype, -lim2, lim2)
    return w1, b1, w2, b2


if __name__ == "__main__":
    input_size, hidden_size, output_size = 16, 32, 4
    batch = 8

    key = jax.random.PRNGKey(0)
    kx, kp = jax.random.split(key)
    x = jax.random.normal(kx, (batch, input_size), jnp.float32)
    w1, b1, w2, b2 = init_params(kp, input_size, hidden_size, output_size)

    out = mlp_forward(x, w1, b1, w2, b2)
    jax.block_until_ready(out)

    # Reference with matching numerics (bf16 operands, f32 accumulation).
    xb, w1b, w2b = (a.astype(jnp.bfloat16) for a in (x, w1, w2))
    h_ref = jnp.maximum(jnp.dot(xb, w1b, preferred_element_type=jnp.float32) + b1, 0.0)
    ref = jnp.dot(h_ref.astype(jnp.bfloat16), w2b,
                  preferred_element_type=jnp.float32) + b2

    assert out.shape == (batch, output_size)
    assert jnp.allclose(out, ref.astype(out.dtype), atol=2e-3, rtol=2e-3), (
        float(jnp.max(jnp.abs(out - ref.astype(out.dtype)))))

    print("KERNEL_OK")
</pallas_src>

<mosaic_0001>
module attributes {stable_mosaic.version = 11 : i64} {
  func.func @mlp_kernel(%arg0: i32, %arg1: memref<8x16xbf16, #tpu.memory_space<vmem>>, %arg2: memref<16x32xbf16, #tpu.memory_space<vmem>>, %arg3: memref<1x32xf32, #tpu.memory_space<vmem>>, %arg4: memref<32x128xbf16, #tpu.memory_space<vmem>>, %arg5: memref<1x128xf32, #tpu.memory_space<vmem>>, %arg6: memref<8x128xf32, #tpu.memory_space<vmem>>) attributes {dimension_semantics = [#tpu.dimension_semantics<parallel>], iteration_bounds = array<i64: 1>, scalar_prefetch = 0 : i64, scratch_operands = 0 : i64, tpu.core_type = #tpu.core_type<tc>, window_params = [{transform_indices = @transform_0, window_bounds = array<i64: 8, 16>}, {pipeline_mode = #tpu.pipeline_mode<synchronous>, transform_indices = @transform_1, window_bounds = array<i64: 16, 32>}, {pipeline_mode = #tpu.pipeline_mode<synchronous>, transform_indices = @transform_2, window_bounds = array<i64: 1, 32>}, {pipeline_mode = #tpu.pipeline_mode<synchronous>, transform_indices = @transform_3, window_bounds = array<i64: 32, 128>}, {pipeline_mode = #tpu.pipeline_mode<synchronous>, transform_indices = @transform_4, window_bounds = array<i64: 1, 128>}, {transform_indices = @transform_5, window_bounds = array<i64: 8, 128>}]} {
    %c0 = arith.constant 0 : index
    %c0_0 = arith.constant 0 : index
    %0 = vector.load %arg1[%c0, %c0_0] : memref<8x16xbf16, #tpu.memory_space<vmem>>, vector<8x16xbf16>
    %c0_1 = arith.constant 0 : index
    %c0_2 = arith.constant 0 : index
    %1 = vector.load %arg2[%c0_1, %c0_2] : memref<16x32xbf16, #tpu.memory_space<vmem>>, vector<16x32xbf16>
    %cst = arith.constant dense<0.000000e+00> : vector<8x32xf32>
    %2 = tpu.matmul %0, %1, %cst {dimension_numbers = #tpu.dot_dimension_numbers<[1], [0], [0], [1], [0, 0, 1, 1], [], []>} : vector<8x16xbf16>, vector<16x32xbf16>, vector<8x32xf32> -> vector<8x32xf32>
    %c0_3 = arith.constant 0 : index
    %c0_4 = arith.constant 0 : index
    %3 = vector.load %arg3[%c0_3, %c0_4] : memref<1x32xf32, #tpu.memory_space<vmem>>, vector<1x32xf32>
    %4 = vector.broadcast %3 : vector<1x32xf32> to vector<8x32xf32>
    %5 = arith.addf %2, %4 : vector<8x32xf32>
    %cst_5 = arith.constant 0.000000e+00 : f32
    %6 = vector.broadcast %cst_5 : f32 to vector<8x32xf32>
    %7 = arith.maximumf %5, %6 : vector<8x32xf32>
    %8 = arith.truncf %7 : vector<8x32xf32> to vector<8x32xbf16>
    %c0_6 = arith.constant 0 : index
    %c0_7 = arith.constant 0 : index
    %9 = vector.load %arg4[%c0_6, %c0_7] : memref<32x128xbf16, #tpu.memory_space<vmem>>, vector<32x128xbf16>
    %cst_8 = arith.constant dense<0.000000e+00> : vector<8x128xf32>
    %10 = tpu.matmul %8, %9, %cst_8 {dimension_numbers = #tpu.dot_dimension_numbers<[1], [0], [0], [1], [0, 0, 1, 1], [], []>} : vector<8x32xbf16>, vector<32x128xbf16>, vector<8x128xf32> -> vector<8x128xf32>
    %c0_9 = arith.constant 0 : index
    %c0_10 = arith.constant 0 : index
    %11 = vector.load %arg5[%c0_9, %c0_10] : memref<1x128xf32, #tpu.memory_space<vmem>>, vector<1x128xf32>
    %12 = vector.broadcast %11 : vector<1x128xf32> to vector<8x128xf32>
    %13 = arith.addf %10, %12 : vector<8x128xf32>
    %c0_11 = arith.constant 0 : index
    %c0_12 = arith.constant 0 : index
    %14 = vector.load %arg6[%c0_11, %c0_12] : memref<8x128xf32, #tpu.memory_space<vmem>>, vector<8x128xf32>
    tpu.vector_store %arg6[%c0_11, %c0_12], %13 {strides = array<i32>} : memref<8x128xf32, #tpu.memory_space<vmem>>, vector<8x128xf32>,
    return
  }
  func.func @transform_0(%arg0: i32) -> (i32, i32) {
    %c0_i32 = arith.constant 0 : i32
    %c0_i32_0 = arith.constant 0 : i32
    return %arg0, %c0_i32 : i32, i32
  }
  func.func @transform_1(%arg0: i32) -> (i32, i32) {
    %c0_i32 = arith.constant 0 : i32
    %c0_i32_0 = arith.constant 0 : i32
    %c0_i32_1 = arith.constant 0 : i32
    return %c0_i32, %c0_i32_0 : i32, i32
  }
  func.func @transform_2(%arg0: i32) -> (i32, i32) {
    %c0_i32 = arith.constant 0 : i32
    %c0_i32_0 = arith.constant 0 : i32
    %c0_i32_1 = arith.constant 0 : i32
    return %c0_i32, %c0_i32_0 : i32, i32
  }
  func.func @transform_3(%arg0: i32) -> (i32, i32) {
    %c0_i32 = arith.constant 0 : i32
    %c0_i32_0 = arith.constant 0 : i32
    %c0_i32_1 = arith.constant 0 : i32
    return %c0_i32, %c0_i32_0 : i32, i32
  }
  func.func @transform_4(%arg0: i32) -> (i32, i32) {
    %c0_i32 = arith.constant 0 : i32
    %c0_i32_0 = arith.constant 0 : i32
    %c0_i32_1 = arith.constant 0 : i32
    return %c0_i32, %c0_i32_0 : i32, i32
  }
  func.func @transform_5(%arg0: i32) -> (i32, i32) {
    %c0_i32 = arith.constant 0 : i32
    %c0_i32_0 = arith.constant 0 : i32
    return %arg0, %c0_i32 : i32, i32
  }
}

module attributes {stable_mosaic.version = 11 : i64} {
  func.func @mlp_kernel(%arg0: i32, %arg1: memref<8x16xbf16, #tpu.memory_space<vmem>>, %arg2: memref<16x32xbf16, #tpu.memory_space<vmem>>, %arg3: memref<1x32xf32, #tpu.memory_space<vmem>>, %arg4: memref<32x128xbf16, #tpu.memory_space<vmem>>, %arg5: memref<1x128xf32, #tpu.memory_space<vmem>>, %arg6: memref<8x128xf32, #tpu.memory_space<vmem>>) attributes {dimension_semantics = [#tpu.dimension_semantics<parallel>], iteration_bounds = array<i64: 1>, scalar_prefetch = 0 : i64, scratch_operands = 0 : i64, tpu.core_type = #tpu.core_type<tc>, window_params = [{transform_indices = @transform_0, window_bounds = array<i64: 8, 16>}, {pipeline_mode = #tpu.pipeline_mode<synchronous>, transform_indices = @transform_1, window_bounds = array<i64: 16, 32>}, {pipeline_mode = #tpu.pipeline_mode<synchronous>, transform_indices = @transform_2, window_bounds = array<i64: 1, 32>}, {pipeline_mode = #tpu.pipeline_mode<synchronous>, transform_indices = @transform_3, window_bounds = array<i64: 32, 128>}, {pipeline_mode = #tpu.pipeline_mode<synchronous>, transform_indices = @transform_4, window_bounds = array<i64: 1, 128>}, {transform_indices = @transform_5, window_bounds = array<i64: 8, 128>}]} {
    %c0 = arith.constant 0 : index
    %c0_0 = arith.constant 0 : index
    %0 = vector.load %arg1[%c0, %c0_0] : memref<8x16xbf16, #tpu.memory_space<vmem>>, vector<8x16xbf16>
    %c0_1 = arith.constant 0 : index
    %c0_2 = arith.constant 0 : index
    %1 = vector.load %arg2[%c0_1, %c0_2] : memref<16x32xbf16, #tpu.memory_space<vmem>>, vector<16x32xbf16>
    %cst = arith.constant dense<0.000000e+00> : vector<8x32xf32>
    %2 = tpu.matmul %0, %1, %cst {dimension_numbers = #tpu.dot_dimension_numbers<[1], [0], [0], [1], [0, 0, 1, 1], [], []>} : vector<8x16xbf16>, vector<16x32xbf16>, vector<8x32xf32> -> vector<8x32xf32>
    %c0_3 = arith.constant 0 : index
    %c0_4 = arith.constant 0 : index
    %3 = vector.load %arg3[%c0_3, %c0_4] : memref<1x32xf32, #tpu.memory_space<vmem>>, vector<1x32xf32>
    %4 = vector.broadcast %3 : vector<1x32xf32> to vector<8x32xf32>
    %5 = arith.addf %2, %4 : vector<8x32xf32>
    %cst_5 = arith.constant 0.000000e+00 : f32
    %6 = vector.broadcast %cst_5 : f32 to vector<8x32xf32>
    %7 = arith.maximumf %5, %6 : vector<8x32xf32>
    %8 = arith.truncf %7 : vector<8x32xf32> to vector<8x32xbf16>
    %c0_6 = arith.constant 0 : index
    %c0_7 = arith.constant 0 : index
    %9 = vector.load %arg4[%c0_6, %c0_7] : memref<32x128xbf16, #tpu.memory_space<vmem>>, vector<32x128xbf16>
    %cst_8 = arith.constant dense<0.000000e+00> : vector<8x128xf32>
    %10 = tpu.matmul %8, %9, %cst_8 {dimension_numbers = #tpu.dot_dimension_numbers<[1], [0], [0], [1], [0, 0, 1, 1], [], []>} : vector<8x32xbf16>, vector<32x128xbf16>, vector<8x128xf32> -> vector<8x128xf32>
    %c0_9 = arith.constant 0 : index
    %c0_10 = arith.constant 0 : index
    %11 = vector.load %arg5[%c0_9, %c0_10] : memref<1x128xf32, #tpu.memory_space<vmem>>, vector<1x128xf32>
    %12 = vector.broadcast %11 : vector<1x128xf32> to vector<8x128xf32>
    %13 = arith.addf %10, %12 : vector<8x128xf32>
    %c0_11 = arith.constant 0 : index
    %c0_12 = arith.constant 0 : index
    %14 = vector.load %arg6[%c0_11, %c0_12] : memref<8x128xf32, #tpu.memory_space<vmem>>, vector<8x128xf32>
    tpu.vector_store %arg6[%c0_11, %c0_12], %13 {strides = array<i32>} : memref<8x128xf32, #tpu.memory_space<vmem>>, vector<8x128xf32>,
    return
  }
  func.func @transform_0(%arg0: i32) -> (i32, i32) {
    %c0_i32 = arith.constant 0 : i32
    %c0_i32_0 = arith.constant 0 : i32
    return %arg0, %c0_i32 : i32, i32
  }
  func.func @transform_1(%arg0: i32) -> (i32, i32) {
    %c0_i32 = arith.constant 0 : i32
    %c0_i32_0 = arith.constant 0 : i32
    %c0_i32_1 = arith.constant 0 : i32
    return %c0_i32, %c0_i32_0 : i32, i32
  }
  func.func @transform_2(%arg0: i32) -> (i32, i32) {
    %c0_i32 = arith.constant 0 : i32
    %c0_i32_0 = arith.constant 0 : i32
    %c0_i32_1 = arith.constant 0 : i32
    return %c0_i32, %c0_i32_0 : i32, i32
  }
  func.func @transform_3(%arg0: i32) -> (i32, i32) {
    %c0_i32 = arith.constant 0 : i32
    %c0_i32_0 = arith.constant 0 : i32
    %c0_i32_1 = arith.constant 0 : i32
    return %c0_i32, %c0_i32_0 : i32, i32
  }
  func.func @transform_4(%arg0: i32) -> (i32, i32) {
    %c0_i32 = arith.constant 0 : i32
    %c0_i32_0 = arith.constant 0 : i32
    %c0_i32_1 = arith.constant 0 : i32
    return %c0_i32, %c0_i32_0 : i32, i32
  }
  func.func @transform_5(%arg0: i32) -> (i32, i32) {
    %c0_i32 = arith.constant 0 : i32
    %c0_i32_0 = arith.constant 0 : i32
    return %arg0, %c0_i32 : i32, i32
  }
}

</mosaic_0001>

<bundles_post_ra>
// kernel: tpu_custom_call.1
= control target key start
LH: loop header
LB: loop body
LE: loop exit
PB: predicated region body
PF: predicated region fallthrough
CT: control target
= control target key end

     0   :  { %10 = vsyncpa [#allocation3], 0  ;;  %s336_s0 = inlined_call_operand.hbm [shape: bf16[8,16], index: 0, kind: input, shape index: {}]   ;;  %s337_s1 = inlined_call_operand.hbm [shape: bf16[16,32], index: 1, kind: input, shape index: {}]   ;;  %s338_s2 = inlined_call_operand.vmem [shape: f32[1,32], index: 2, kind: input, shape index: {}]   ;;  %s339_s3 = inlined_call_operand.hbm [shape: bf16[32,128], index: 3, kind: input, shape index: {}]   ;;  %s340_s4 = inlined_call_operand.vmem [shape: f32[1,128], index: 4, kind: input, shape index: {}]   ;;  %s341_s5 = inlined_call_operand.hbm [shape: f32[8,128], index: 5, kind: output, shape index: {}]  }
   0x1   :  { %11 = vsyncpa [#allocation6], 0  ;;  %s28_s20 = sshll.u32 %s337_s1, 4  ;;  %s29_s20 = int_to_ptr.hbm [resolvable:$true] %s28_s20 }
   0x2   :  { %12 = vsyncpa [#allocation4], 0  ;;  %s282_s21 = smov [#allocation5]   ;;  %s18_s25 = sshll.u32 %s336_s0, 4  ;;  %s19_s25 = int_to_ptr.hbm [resolvable:$true] %s18_s25 }
   0x3   :  { %s30_s22 = sshll.u32 %s282_s21, 4  ;;  %s283_s26 = smov 64   ;;  %s31_s22 = int_to_ptr.vmem [resolvable:$true] %s30_s22 }
   0x4   :  { %s284_s27 = smov 4   ;;  %s285_s28 = smov [#allocation2]  }
   0x5   :  { %36 = dma.hbm_to_vmem [thread:$0]  %s29_s20, 128, %s31_s22, [#allocation6], %s283_s26, %s283_s26, %s284_s27  }
   0x6   :  { %s20_s29 = sshll.u32 %s285_s28, 4  ;;  %s43_s7 = sshll.u32 %s339_s3, 4  ;;  %s21_s29 = int_to_ptr.vmem [resolvable:$true] %s20_s29  ;;  %s44_s7 = int_to_ptr.hbm [resolvable:$true] %s43_s7 }
   0x7   :  { %23 = dma.hbm_to_vmem [thread:$0]  %s19_s25, 64, %s21_s29, [#allocation3]  }
   0x8   :  { %s286_s1 = smov [#allocation7]  }
   0x9   :  { %s45_s8 = sshll.u32 %s286_s1, 4  ;;  %s46_s8 = int_to_ptr.vmem [resolvable:$true] %s45_s8 }
   0xa   :  { %51 = dma.hbm_to_vmem [thread:$0]  %s44_s7, 256, %s46_s8, [#allocation6], %s283_s26, %s283_s26, %s284_s27  }
   0xb   :  { %276 = dma.done.wait [#allocation3], 64  }
   0xc   :  { %277 = vsyncadd [#allocation3], 4294967232 }
   0xd   :  { %278 = dma.done.wait [#allocation6], 384  }
   0xe   :  { %279 = vsyncadd [#allocation6], 4294966912  ;;  %v169_v0 = vld [vmem:[#allocation5] sm:$0xff]  ;;  %v67_v1 = vld [vmem:[#allocation2] sm:$0xf]  ;;  %vm80_vm0 = vcmask 130048  }
   0xf   :  { %91 = vmatpush.bf16.msra.mxu0 %v169_v0  ;;  %v171_v2 = vld [vmem:[#allocation7 + $0x8] sm:$0xff]  ;;  %v170_v3 = vld [vmem:[#allocation7] sm:$0xff]  ;;  %v178_v4 = vld [vmem:[%s338_s2] ss:$0 sm:$0xff]  ;;  %vm119_vm1 = vcmask 261120   ;;  %s287_s11 = smov [#allocation8]  }
  0x10   :  { %129 = vmatpush.bf16.msra.mxu1 %v171_v2  ;;  %v179_v10 = vld [vmem:[%s340_s4] ss:$0 sm:$0xff]  ;;  %s142_s12 = sshll.u32 %s287_s11, 4  ;;  %s144_s15 = sshll.u32 %s341_s5, 4  ;;  %s143_s12 = int_to_ptr.vmem [resolvable:$true] %s142_s12  ;;  %s145_s15 = int_to_ptr.hbm [resolvable:$true] %s144_s15 }
  0x12   :  { %159 = vmatmul.msk.bf16.vlgmr.msra.gmra.mxu0 %vm80_vm0, %v67_v1 }
  0x14   :  { %130 = vmatpush.bf16.msra.mxu1 %v170_v3 }
  0x8f   :  { %v93_v5 = vpop.f32.mrf.mxu0 }
  0x90   :  { %v94_v6 = vadd.f32 %v178_v4, %v93_v5 }
  0x92   :  { %v97_v7 = vmax.f32 %v94_v6, 0.0 }
  0x94   :  { %v98_v8 = vpack.c.bf16 %v97_v7, %v97_v7 }
  0x96   :  { %168 = vmatmul.msk.bf16.vlgmr.msra.gmra.mxu1 %vm119_vm1, %v98_v8 }
  0x97   :  { %v95_v9 = vpop.f32.mrf.mxu0 }
 0x113   :  { %v132_v11 = vpop.f32.mrf.mxu1 }
 0x114   :  { %v133_v12 = vadd.f32 %v179_v10, %v132_v11 }
 0x116   :  { %136 = vst [vmem:[#allocation8] sm:$0xff] %v133_v12 }
 0x117   :  { %147 = dma.vmem_to_hbm [thread:$0]  %s143_s12, 128, %s145_s15, [#allocation4]  }
 0x11b   :  { %v134_v13 = vpop.f32.mrf.mxu1 }
 0x11c   :  { %280 = dma.done.wait [#allocation4], 128  }
 0x11d   :  { %281 = vsyncadd [#allocation4], 4294967168 }
 0x11e   :  { %152 = vsyncpa [#allocation3], 1 }
 0x11f   :  { %153 = vsyncpa [#allocation6], 1 }
 0x120   :  { %154 = vsyncpa [#allocation4], 1 }

// kernel: tpu_custom_call.1
= control target key start
LH: loop header
LB: loop body
LE: loop exit
PB: predicated region body
PF: predicated region fallthrough
CT: control target
= control target key end

     0   :  { %10 = vsyncpa [#allocation3], 0  ;;  %s336_s0 = inlined_call_operand.hbm [shape: bf16[8,16], index: 0, kind: input, shape index: {}]   ;;  %s337_s1 = inlined_call_operand.hbm [shape: bf16[16,32], index: 1, kind: input, shape index: {}]   ;;  %s338_s2 = inlined_call_operand.vmem [shape: f32[1,32], index: 2, kind: input, shape index: {}]   ;;  %s339_s3 = inlined_call_operand.hbm [shape: bf16[32,128], index: 3, kind: input, shape index: {}]   ;;  %s340_s4 = inlined_call_operand.vmem [shape: f32[1,128], index: 4, kind: input, shape index: {}]   ;;  %s341_s5 = inlined_call_operand.hbm [shape: f32[8,128], index: 5, kind: output, shape index: {}]  }
   0x1   :  { %11 = vsyncpa [#allocation6], 0  ;;  %s28_s20 = sshll.u32 %s337_s1, 4  ;;  %s29_s20 = int_to_ptr.hbm [resolvable:$true] %s28_s20 }
   0x2   :  { %12 = vsyncpa [#allocation4], 0  ;;  %s282_s21 = smov [#allocation5]   ;;  %s18_s25 = sshll.u32 %s336_s0, 4  ;;  %s19_s25 = int_to_ptr.hbm [resolvable:$true] %s18_s25 }
   0x3   :  { %s30_s22 = sshll.u32 %s282_s21, 4  ;;  %s283_s26 = smov 64   ;;  %s31_s22 = int_to_ptr.vmem [resolvable:$true] %s30_s22 }
   0x4   :  { %s284_s27 = smov 4   ;;  %s285_s28 = smov [#allocation2]  }
   0x5   :  { %36 = dma.hbm_to_vmem [thread:$0]  %s29_s20, 128, %s31_s22, [#allocation6], %s283_s26, %s283_s26, %s284_s27  }
   0x6   :  { %s20_s29 = sshll.u32 %s285_s28, 4  ;;  %s43_s7 = sshll.u32 %s339_s3, 4  ;;  %s21_s29 = int_to_ptr.vmem [resolvable:$true] %s20_s29  ;;  %s44_s7 = int_to_ptr.hbm [resolvable:$true] %s43_s7 }
   0x7   :  { %23 = dma.hbm_to_vmem [thread:$0]  %s19_s25, 64, %s21_s29, [#allocation3]  }
   0x8   :  { %s286_s1 = smov [#allocation7]  }
   0x9   :  { %s45_s8 = sshll.u32 %s286_s1, 4  ;;  %s46_s8 = int_to_ptr.vmem [resolvable:$true] %s45_s8 }
   0xa   :  { %51 = dma.hbm_to_vmem [thread:$0]  %s44_s7, 256, %s46_s8, [#allocation6], %s283_s26, %s283_s26, %s284_s27  }
   0xb   :  { %276 = dma.done.wait [#allocation3], 64  }
   0xc   :  { %277 = vsyncadd [#allocation3], 4294967232 }
   0xd   :  { %278 = dma.done.wait [#allocation6], 384  }
   0xe   :  { %279 = vsyncadd [#allocation6], 4294966912  ;;  %v169_v0 = vld [vmem:[#allocation5] sm:$0xff]  ;;  %v67_v1 = vld [vmem:[#allocation2] sm:$0xf]  ;;  %vm80_vm0 = vcmask 130048  }
   0xf   :  { %91 = vmatpush.bf16.msra.mxu0 %v169_v0  ;;  %v171_v2 = vld [vmem:[#allocation7 + $0x8] sm:$0xff]  ;;  %v170_v3 = vld [vmem:[#allocation7] sm:$0xff]  ;;  %v178_v4 = vld [vmem:[%s338_s2] ss:$0 sm:$0xff]  ;;  %vm119_vm1 = vcmask 261120   ;;  %s287_s11 = smov [#allocation8]  }
  0x10   :  { %129 = vmatpush.bf16.msra.mxu1 %v171_v2  ;;  %v179_v10 = vld [vmem:[%s340_s4] ss:$0 sm:$0xff]  ;;  %s142_s12 = sshll.u32 %s287_s11, 4  ;;  %s144_s15 = sshll.u32 %s341_s5, 4  ;;  %s143_s12 = int_to_ptr.vmem [resolvable:$true] %s142_s12  ;;  %s145_s15 = int_to_ptr.hbm [resolvable:$true] %s144_s15 }
  0x12   :  { %159 = vmatmul.msk.bf16.vlgmr.msra.gmra.mxu0 %vm80_vm0, %v67_v1 }
  0x14   :  { %130 = vmatpush.bf16.msra.mxu1 %v170_v3 }
  0x8f   :  { %v93_v5 = vpop.f32.mrf.mxu0 }
  0x90   :  { %v94_v6 = vadd.f32 %v178_v4, %v93_v5 }
  0x92   :  { %v97_v7 = vmax.f32 %v94_v6, 0.0 }
  0x94   :  { %v98_v8 = vpack.c.bf16 %v97_v7, %v97_v7 }
  0x96   :  { %168 = vmatmul.msk.bf16.vlgmr.msra.gmra.mxu1 %vm119_vm1, %v98_v8 }
  0x97   :  { %v95_v9 = vpop.f32.mrf.mxu0 }
 0x113   :  { %v132_v11 = vpop.f32.mrf.mxu1 }
 0x114   :  { %v133_v12 = vadd.f32 %v179_v10, %v132_v11 }
 0x116   :  { %136 = vst [vmem:[#allocation8] sm:$0xff] %v133_v12 }
 0x117   :  { %147 = dma.vmem_to_hbm [thread:$0]  %s143_s12, 128, %s145_s15, [#allocation4]  }
 0x11b   :  { %v134_v13 = vpop.f32.mrf.mxu1 }
 0x11c   :  { %280 = dma.done.wait [#allocation4], 128  }
 0x11d   :  { %281 = vsyncadd [#allocation4], 4294967168 }
 0x11e   :  { %152 = vsyncpa [#allocation3], 1 }
 0x11f   :  { %153 = vsyncpa [#allocation6], 1 }
 0x120   :  { %154 = vsyncpa [#allocation4], 1 }

</bundles_post_ra>
